<compile_context>
chip_gen: v6e
topology: v6e:2x2x1
jax: 0.10.0
libtpu: 0.0.40
codegen_flags: <defaults>
</compile_context>

<pallas_src>
import functools

import jax
import jax.numpy as jnp
from jax.experimental import pallas as pl
from jax.experimental.pallas import tpu as pltpu


# ------------------------- kernel-side math -------------------------

def _opt_aeg_d3_kernel(params_ref, x_ref, o_ref):
    # params_ref: SMEM (16,) f32 pre-folded scalar parameters
    #   [0]      half_alpha              (= 0.5 * alpha)
    #   [1:5]    ux_h, u_a0, u_a1, u_a2  (all pre-scaled by 0.5)
    #   [5:9]    vx_h, v_a0, v_a1, v_a2  (all pre-scaled by 0.5)
    #   [9:13]   wx_h, w_a0, w_a1, w_a2  (all pre-scaled by 0.5)
    #   [13:16]  af_h, mf_h, pf_h        (= 0.5 * {a,m,p}factor)
    # x_ref / o_ref: VMEM (row_tile, LANE) tile of the flattened array.
    half_alpha = params_ref[0]
    uxh, ua0, ua1, ua2 = params_ref[1], params_ref[2], params_ref[3], params_ref[4]
    vxh, va0, va1, va2 = params_ref[5], params_ref[6], params_ref[7], params_ref[8]
    wxh, wa0, wa1, wa2 = params_ref[9], params_ref[10], params_ref[11], params_ref[12]
    afh, mfh, pfh = params_ref[13], params_ref[14], params_ref[15]

    x = x_ref[...].astype(jnp.float32)

    # sigmoid(alpha*x) with the 0.5 scale pre-folded into half_alpha.
    data = 0.5 * jnp.tanh(half_alpha * x) + 0.5

    # Hoisted transcendentals shared by all four flow applications.
    # data >= 0, so abs() is unnecessary.
    log = jnp.log(data)
    loglog = log * log
    t = jnp.tanh(data)

    # Scalar-parameter flows, pre-folded & pre-halved: uh == 0.5 * u, etc.
    uh = data * (ua0 + log * ua1 + loglog * ua2) + uxh
    vh = data * (va0 + log * va1 + loglog * va2) + vxh
    wh = data * (wa0 + log * wa1 + loglog * wa2) + wxh

    # sigmoid(u) = 0.5*(tanh(u/2)+1); the 0.5 lives in afh/mfh/pfh.
    dx = afh * t * (jnp.tanh(uh) + 1.0)

    dy = mfh * t * (jnp.tanh(vh) + 1.0)
    b2 = 1.0 + dy + dy * dy * 0.5                       # consume dy immediately

    dz = pfh * t * (jnp.tanh(wh) + 1.0)
    b1 = 1.0 + log * dz + (loglog + log) * (dz * dz * 0.5)  # consume dz immediately

    o_ref[...] = (data * b1 * b2 + dx).astype(o_ref.dtype)


# ----------------------------- wrapper ------------------------------

LANE = 128           # multiple of 128 -> unmasked stores; padding rarely needed
MAX_ROW_TILE = 2048  # (2048, 128) f32 block = 1 MiB; ~4 MiB dbl-buffered in+out
TARGET_GRID_STEPS = 8  # >=2 for v7x dual-TC split, >=4 for DMA/compute overlap


def _choose_row_tile(rows):
    """Row tile: multiple of 8, ~TARGET_GRID_STEPS grid steps, <= 1 MiB block."""
    if rows <= 8:
        return rows                       # full-array block (tiny inputs)
    tile = -(-rows // TARGET_GRID_STEPS)  # cdiv
    tile = ((tile + 7) // 8) * 8          # (8,128) sublane alignment
    return min(tile, MAX_ROW_TILE)


def _expand_params(params):
    """(13,) raw module params -> (16,) f32 with flow polys + 0.5s pre-folded."""
    p = params.astype(jnp.float32)
    half_alpha = 0.5 * p[0]

    def coeffs(xi, yi, zi):
        x_, y_, z_ = p[xi], p[yi], p[zi]
        ym = 1.0 + y_ + y_ * y_ * 0.5      # (1 + dy + dy^2/2)
        c1 = z_ + z_ * z_ * 0.5            # coeff of log
        c2 = z_ * z_ * 0.5                 # coeff of log^2
        # Pre-scale by 0.5 so the kernel computes u_half = 0.5*u directly.
        return 0.5 * jnp.stack([x_, ym, c1 * ym, c2 * ym])

    return jnp.concatenate([half_alpha[None],
                            coeffs(1, 2, 3),     # u
                            coeffs(4, 5, 6),     # v
                            coeffs(7, 8, 9),     # w
                            0.5 * p[10:13]])     # afactor, mfactor, pfactor


@functools.partial(jax.jit, static_argnames=())
def opt_aeg_d3_forward(x, params):
    """x: any shape (e.g. NCHW). params: (13,) raw module scalars."""
    shape = x.shape
    dtype = x.dtype
    n = x.size
    flat = x.reshape(-1)

    # Pad only when the flat size is not a multiple of LANE=128 (rare).
    # TODO(synk): handle the ragged tail in-kernel (SMEM length + lane mask on
    # the last block) to kill this extra HBM round trip entirely.
    n_pad = ((n + LANE - 1) // LANE) * LANE
    if n_pad != n:
        flat = jnp.pad(flat, (0, n_pad - n))
    rows = n_pad // LANE
    flat2d = flat.reshape(rows, LANE)

    row_tile = _choose_row_tile(rows)
    grid = (pl.cdiv(rows, row_tile),)

    ext = _expand_params(params)

    itemsize = jnp.dtype(dtype).itemsize
    cost = pl.CostEstimate(flops=48 * n,
                           transcendentals=6 * n,
                           bytes_accessed=2 * n * itemsize)

    out = pl.pallas_call(
        _opt_aeg_d3_kernel,
        out_shape=jax.ShapeDtypeStruct((rows, LANE), dtype),
        grid_spec=pltpu.PrefetchScalarGridSpec(
            num_scalar_prefetch=0,
            grid=grid,
            in_specs=[
                pl.BlockSpec(memory_space=pltpu.MemorySpace.SMEM),  # params
                pl.BlockSpec((row_tile, LANE), lambda i: (i, 0)),   # data
            ],
            out_specs=pl.BlockSpec((row_tile, LANE), lambda i: (i, 0)),
        ),
        compiler_params=pltpu.CompilerParams(
            dimension_semantics=("parallel",)),
        cost_estimate=cost,
    )(ext, flat2d)

    out_flat = out.reshape(-1)
    if n_pad != n:
        out_flat = out_flat[:n]
    return out_flat.reshape(shape)


# ---------------------- pure-JAX reference --------------------------

def _flow_ref(a, dx, dy, dz):
    log = jnp.log(jnp.abs(a))
    return (a
            * (1.0 + log * dz + (log * log + log) * dz * dz / 2.0)
            * (1.0 + dy + dy * dy / 2.0)
            + dx)


def _ref_forward(x, params):
    alpha = params[0]
    ux, uy, uz = params[1], params[2], params[3]
    vx, vy, vz = params[4], params[5], params[6]
    wx, wy, wz = params[7], params[8], params[9]
    afactor, mfactor, pfactor = params[10], params[11], params[12]

    shape = x.shape
    data = x.reshape(shape[0], -1).astype(jnp.float32)
    data = jax.nn.sigmoid(alpha * data)
    u = _flow_ref(data, ux, uy, uz)
    v = _flow_ref(data, vx, vy, vz)
    w = _flow_ref(data, wx, wy, wz)
    dx = afactor * jnp.tanh(data) * jax.nn.sigmoid(u)
    dy = mfactor * jnp.tanh(data) * jax.nn.sigmoid(v)
    dz = pfactor * jnp.tanh(data) * jax.nn.sigmoid(w)
    data = _flow_ref(data, dx, dy, dz)
    return data.reshape(shape).astype(x.dtype)


# ------------------------------ main --------------------------------

if __name__ == "__main__":
    key = jax.random.PRNGKey(0)
    kx, kp = jax.random.split(key)

    # NCHW input, small shapes consistent with an MNIST-style conv feature map.
    x = jax.random.normal(kx, (2, 4, 16, 16), dtype=jnp.float32)

    # The PyTorch module initializes all 13 scalars to zero (forward would be
    # trivially 0.5 everywhere); use small random scalars for a real test.
    params = 0.1 * jax.random.normal(kp, (13,), dtype=jnp.float32)

    out = opt_aeg_d3_forward(x, params)
    out = jax.block_until_ready(out)

    ref = _ref_forward(x, params)
    assert out.shape == x.shape
    assert out.dtype == x.dtype
    assert jnp.allclose(out, ref, atol=1e-5, rtol=1e-5), (
        float(jnp.max(jnp.abs(out - ref))))

    print("KERNEL_OK")
</pallas_src>

<mosaic_0001>
module attributes {stable_mosaic.version = 11 : i64} {
  func.func @_opt_aeg_d3_kernel(%arg0: i32, %arg1: memref<16xf32, #tpu.memory_space<smem>>, %arg2: memref<8x128xf32, #tpu.memory_space<vmem>>, %arg3: memref<8x128xf32, #tpu.memory_space<vmem>>) attributes {dimension_semantics = [#tpu.dimension_semantics<parallel>], iteration_bounds = array<i64: 2>, scalar_prefetch = 0 : i64, scratch_operands = 0 : i64, tpu.core_type = #tpu.core_type<tc>, window_params = [{transform_indices = @transform_0, window_bounds = array<i64: 16>}, {transform_indices = @transform_1, window_bounds = array<i64: 8, 128>}, {transform_indices = @transform_2, window_bounds = array<i64: 8, 128>}]} {
    %c0 = arith.constant 0 : index
    %0 = memref.load %arg1[%c0] : memref<16xf32, #tpu.memory_space<smem>>
    %c1 = arith.constant 1 : index
    %1 = memref.load %arg1[%c1] : memref<16xf32, #tpu.memory_space<smem>>
    %c2 = arith.constant 2 : index
    %2 = memref.load %arg1[%c2] : memref<16xf32, #tpu.memory_space<smem>>
    %c3 = arith.constant 3 : index
    %3 = memref.load %arg1[%c3] : memref<16xf32, #tpu.memory_space<smem>>
    %c4 = arith.constant 4 : index
    %4 = memref.load %arg1[%c4] : memref<16xf32, #tpu.memory_space<smem>>
    %c5 = arith.constant 5 : index
    %5 = memref.load %arg1[%c5] : memref<16xf32, #tpu.memory_space<smem>>
    %c6 = arith.constant 6 : index
    %6 = memref.load %arg1[%c6] : memref<16xf32, #tpu.memory_space<smem>>
    %c7 = arith.constant 7 : index
    %7 = memref.load %arg1[%c7] : memref<16xf32, #tpu.memory_space<smem>>
    %c8 = arith.constant 8 : index
    %8 = memref.load %arg1[%c8] : memref<16xf32, #tpu.memory_space<smem>>
    %c9 = arith.constant 9 : index
    %9 = memref.load %arg1[%c9] : memref<16xf32, #tpu.memory_space<smem>>
    %c10 = arith.constant 10 : index
    %10 = memref.load %arg1[%c10] : memref<16xf32, #tpu.memory_space<smem>>
    %c11 = arith.constant 11 : index
    %11 = memref.load %arg1[%c11] : memref<16xf32, #tpu.memory_space<smem>>
    %c12 = arith.constant 12 : index
    %12 = memref.load %arg1[%c12] : memref<16xf32, #tpu.memory_space<smem>>
    %c13 = arith.constant 13 : index
    %13 = memref.load %arg1[%c13] : memref<16xf32, #tpu.memory_space<smem>>
    %c14 = arith.constant 14 : index
    %14 = memref.load %arg1[%c14] : memref<16xf32, #tpu.memory_space<smem>>
    %c15 = arith.constant 15 : index
    %15 = memref.load %arg1[%c15] : memref<16xf32, #tpu.memory_space<smem>>
    %c0_0 = arith.constant 0 : index
    %c0_1 = arith.constant 0 : index
    %16 = vector.load %arg2[%c0_0, %c0_1] : memref<8x128xf32, #tpu.memory_space<vmem>>, vector<8x128xf32>
    %17 = vector.broadcast %0 : f32 to vector<8x128xf32>
    %18 = arith.mulf %17, %16 : vector<8x128xf32>
    %19 = math.tanh %18 : vector<8x128xf32>
    %cst = arith.constant 5.000000e-01 : f32
    %20 = vector.broadcast %cst : f32 to vector<8x128xf32>
    %21 = arith.mulf %20, %19 : vector<8x128xf32>
    %cst_2 = arith.constant 5.000000e-01 : f32
    %22 = vector.broadcast %cst_2 : f32 to vector<8x128xf32>
    %23 = arith.addf %21, %22 : vector<8x128xf32>
    %24 = math.log %23 : vector<8x128xf32>
    %25 = arith.mulf %24, %24 : vector<8x128xf32>
    %26 = math.tanh %23 : vector<8x128xf32>
    %27 = vector.broadcast %3 : f32 to vector<8x128xf32>
    %28 = arith.mulf %24, %27 : vector<8x128xf32>
    %29 = vector.broadcast %2 : f32 to vector<8x128xf32>
    %30 = arith.addf %29, %28 : vector<8x128xf32>
    %31 = vector.broadcast %4 : f32 to vector<8x128xf32>
    %32 = arith.mulf %25, %31 : vector<8x128xf32>
    %33 = arith.addf %30, %32 : vector<8x128xf32>
    %34 = arith.mulf %23, %33 : vector<8x128xf32>
    %35 = vector.broadcast %1 : f32 to vector<8x128xf32>
    %36 = arith.addf %34, %35 : vector<8x128xf32>
    %37 = vector.broadcast %7 : f32 to vector<8x128xf32>
    %38 = arith.mulf %24, %37 : vector<8x128xf32>
    %39 = vector.broadcast %6 : f32 to vector<8x128xf32>
    %40 = arith.addf %39, %38 : vector<8x128xf32>
    %41 = vector.broadcast %8 : f32 to vector<8x128xf32>
    %42 = arith.mulf %25, %41 : vector<8x128xf32>
    %43 = arith.addf %40, %42 : vector<8x128xf32>
    %44 = arith.mulf %23, %43 : vector<8x128xf32>
    %45 = vector.broadcast %5 : f32 to vector<8x128xf32>
    %46 = arith.addf %44, %45 : vector<8x128xf32>
    %47 = vector.broadcast %11 : f32 to vector<8x128xf32>
    %48 = arith.mulf %24, %47 : vector<8x128xf32>
    %49 = vector.broadcast %10 : f32 to vector<8x128xf32>
    %50 = arith.addf %49, %48 : vector<8x128xf32>
    %51 = vector.broadcast %12 : f32 to vector<8x128xf32>
    %52 = arith.mulf %25, %51 : vector<8x128xf32>
    %53 = arith.addf %50, %52 : vector<8x128xf32>
    %54 = arith.mulf %23, %53 : vector<8x128xf32>
    %55 = vector.broadcast %9 : f32 to vector<8x128xf32>
    %56 = arith.addf %54, %55 : vector<8x128xf32>
    %57 = vector.broadcast %13 : f32 to vector<8x128xf32>
    %58 = arith.mulf %57, %26 : vector<8x128xf32>
    %59 = math.tanh %36 : vector<8x128xf32>
    %cst_3 = arith.constant 1.000000e+00 : f32
    %60 = vector.broadcast %cst_3 : f32 to vector<8x128xf32>
    %61 = arith.addf %59, %60 : vector<8x128xf32>
    %62 = arith.mulf %58, %61 : vector<8x128xf32>
    %63 = vector.broadcast %14 : f32 to vector<8x128xf32>
    %64 = arith.mulf %63, %26 : vector<8x128xf32>
    %65 = math.tanh %46 : vector<8x128xf32>
    %cst_4 = arith.constant 1.000000e+00 : f32
    %66 = vector.broadcast %cst_4 : f32 to vector<8x128xf32>
    %67 = arith.addf %65, %66 : vector<8x128xf32>
    %68 = arith.mulf %64, %67 : vector<8x128xf32>
    %cst_5 = arith.constant 1.000000e+00 : f32
    %69 = vector.broadcast %cst_5 : f32 to vector<8x128xf32>
    %70 = arith.addf %69, %68 : vector<8x128xf32>
    %71 = arith.mulf %68, %68 : vector<8x128xf32>
    %cst_6 = arith.constant 5.000000e-01 : f32
    %72 = vector.broadcast %cst_6 : f32 to vector<8x128xf32>
    %73 = arith.mulf %71, %72 : vector<8x128xf32>
    %74 = arith.addf %70, %73 : vector<8x128xf32>
    %75 = vector.broadcast %15 : f32 to vector<8x128xf32>
    %76 = arith.mulf %75, %26 : vector<8x128xf32>
    %77 = math.tanh %56 : vector<8x128xf32>
    %cst_7 = arith.constant 1.000000e+00 : f32
    %78 = vector.broadcast %cst_7 : f32 to vector<8x128xf32>
    %79 = arith.addf %77, %78 : vector<8x128xf32>
    %80 = arith.mulf %76, %79 : vector<8x128xf32>
    %81 = arith.mulf %24, %80 : vector<8x128xf32>
    %cst_8 = arith.constant 1.000000e+00 : f32
    %82 = vector.broadcast %cst_8 : f32 to vector<8x128xf32>
    %83 = arith.addf %82, %81 : vector<8x128xf32>
    %84 = arith.addf %25, %24 : vector<8x128xf32>
    %85 = arith.mulf %80, %80 : vector<8x128xf32>
    %cst_9 = arith.constant 5.000000e-01 : f32
    %86 = vector.broadcast %cst_9 : f32 to vector<8x128xf32>
    %87 = arith.mulf %85, %86 : vector<8x128xf32>
    %88 = arith.mulf %84, %87 : vector<8x128xf32>
    %89 = arith.addf %83, %88 : vector<8x128xf32>
    %90 = arith.mulf %23, %89 : vector<8x128xf32>
    %91 = arith.mulf %90, %74 : vector<8x128xf32>
    %92 = arith.addf %91, %62 : vector<8x128xf32>
    %c0_10 = arith.constant 0 : index
    %c0_11 = arith.constant 0 : index
    %93 = vector.load %arg3[%c0_10, %c0_11] : memref<8x128xf32, #tpu.memory_space<vmem>>, vector<8x128xf32>
    tpu.vector_store %arg3[%c0_10, %c0_11], %92 {strides = array<i32>} : memref<8x128xf32, #tpu.memory_space<vmem>>, vector<8x128xf32>,
    return
  }
  func.func @transform_0(%arg0: i32) -> i32 {
    %c0_i32 = arith.constant 0 : i32
    %c0_i32_0 = arith.constant 0 : i32
    return %c0_i32 : i32
  }
  func.func @transform_1(%arg0: i32) -> (i32, i32) {
    %c0_i32 = arith.constant 0 : i32
    %c0_i32_0 = arith.constant 0 : i32
    return %arg0, %c0_i32 : i32, i32
  }
  func.func @transform_2(%arg0: i32) -> (i32, i32) {
    %c0_i32 = arith.constant 0 : i32
    %c0_i32_0 = arith.constant 0 : i32
    return %arg0, %c0_i32 : i32, i32
  }
}

</mosaic_0001>

<bundles_post_ra>
// kernel: opt_aeg_d3_forward.1
= control target key start
LH: loop header
LB: loop body
LE: loop exit
PB: predicated region body
PF: predicated region fallthrough
CT: control target
= control target key end

     0   :  { %7 = vsyncpa [#allocation3], 0  ;;  %s404_s9 = smov 0   ;;  %s453_s0 = inlined_call_operand.vmem [shape: f32[16], index: 0, kind: input, shape index: {}]   ;;  %s454_s1 = inlined_call_operand.vmem [shape: f32[16,128], index: 1, kind: input, shape index: {}]   ;;  %s455_s2 = inlined_call_operand.vmem [shape: f32[16,128], index: 2, kind: output, shape index: {}]  }
   0x1 LB: > { %s304_s10 = sadd.s32 4294967295, %s386_s9   ;;  %p306_p0 = scmp.ge.s32.totalorder %s386_s9, 1  ;;  %s386_s9 = sphi %s404_s9, %s13_s9  }
   0x2   : > { %p91_p1 = scmp.lt.s32.totalorder %s386_s9, 3  ;;  %s104_s13 = sshll.u32 %s453_s0, 4  ;;  %s105_s13 = int_to_ptr.vmem [resolvable:$true] %s104_s13 }
   0x3   : > { %p338_p3 = scmp.eq.s32.totalorder %s304_s10, 0  ;;  %s361_s15 = scalar_lea.vmem %s105_s13, 16 }
   0x4   : > { %p415_p2 = pnand %p306_p0, %p91_p1  ;;  %p362_p6 = scmp.ne.s32.totalorder %s105_s13, %s361_s15 }
   0x5   : > { %p369_p10 = scmp.lt.s32.totalorder %s105_s13, %s105_s13  ;;  %p370_p11 = scmp.lt.s32.totalorder %s361_s15, %s361_s15 }
   0x6   : > { %p334_p4 = pneg %p415_p2 }
   0x7   : > { %p371_p12 = por %p370_p11, %p369_p10 }
   0x8   : > { %p335_p5 = pnand %p338_p3, %p334_p4 }
   0xa   : > { %p363_p7 = pneg %p335_p5 }
   0xc   : > { %p364_p8 = pnand %p363_p7, %p362_p6 }
   0xe   : > { %p365_p9 = pneg %p364_p8 }
  0x10   : > { %p372_p13 = pnand %p371_p12, %p365_p9 }
  0x12   : > { %375 = shalt.err (!%p372_p13)
}
  0x13   : > { %s388_s16 = smov [#allocation2]   ;;  %124 = sbr.rel (%p415_p2) target bundleno = 114 (0x72), region = 28 }
  0x14   : > { %337 = dma.vmem_to_smem (!%p335_p5), %s105_s13, 16, %s388_s16, [#allocation3]  }
  0x18   : > { %381 = dma.done.wait (%p338_p3), [#allocation3], 16  }
  0x19   : > { %383 = vsyncadd (%p338_p3), [#allocation3], 4294967280 }
  0x1a   : > { %130 = sfence }
  0x1b   : > { %p145_p0 = scmp.lt.s32.totalorder %s304_s10, 1  ;;  %s153_s17 = sld [smem:[#allocation2]] }
  0x1c   : > { %s314_s22 = sld [smem:[#allocation2 + $0x2]] }
  0x1d   : > { %s458_s10 = smov (!%p145_p0, %s304_s10), 1  ;;  %s315_s23 = sld [smem:[#allocation2 + $0x3]] }
  0x1e   : > { %s311_s18 = sshll.u32 %s458_s10, 3  ;;  %s316_s24 = sld [smem:[#allocation2 + $0x4]] }
  0x1f   : > { %s148_s21 = scalar_lea.vmem %s454_s1, %s311_s18  ;;  %s318_s25 = sld [smem:[#allocation2 + $0x6]] }
  0x20   : > { %v169_v0 = vld [vmem:[%s148_s21] sm:$0xff]  ;;  %s319_s26 = sld [smem:[#allocation2 + $0x7]]  ;;  %s152_s13 = scalar_lea.vmem %s455_s2, %s311_s18 }
  0x21   : > { %v170_v1 = vstv %s153_s17  ;;  %s320_s27 = sld [smem:[#allocation2 + $0x8]] }
  0x22   : > { %v171_v2 = vmul.f32 %v170_v1, %v169_v0  ;;  %s323_s28 = sld [smem:[#allocation2 + $0xb]]  ;;  %v181_v11 = vstv %s314_s22 }
  0x23   : > { %s322_s29 = sld [smem:[#allocation2 + $0xa]]  ;;  %v179_v7 = vstv %s315_s23 }
  0x24   : > { %349 = vtanh.f32 %v171_v2  ;;  %s324_s30 = sld [smem:[#allocation2 + $0xc]]  ;;  %v183_v12 = vstv %s316_s24 }
  0x25   : > { %s437_s3 = sld [smem:[#allocation2 + $0x5]]  ;;  %v191_v13 = vstv %s318_s25 }
  0x26   : > { %v189_v8 = vstv %s319_s26  ;;  %s321_s4 = sld [smem:[#allocation2 + $0x9]] }
  0x27   : > { %v193_v14 = vstv %s320_s27  ;;  %s313_s5 = sld [smem:[#allocation2 + $0x1]] }
  0x28   : > { %v199_v9 = vstv %s323_s28  ;;  %s326_s6 = sld [smem:[#allocation2 + $0xe]] }
  0x29   : > { %v201_v15 = vstv %s322_s29  ;;  %s327_s7 = sld [smem:[#allocation2 + $0xf]] }
  0x2a   : > { %v203_v16 = vstv %s324_s30  ;;  %s325_s8 = sld [smem:[#allocation2 + $0xd]] }
  0x2b   : > { %v197_v28 = vstv %s437_s3 }
  0x2c   : > { %v207_v32 = vstv %s321_s4 }
  0x2d   : > { %v187_v37 = vstv %s313_s5 }
  0x2e   : > { %v214_v39 = vstv %s326_s6 }
  0x2f   : > { %v223_v41 = vstv %s327_s7 }
  0x30   : > { %v209_v55 = vstv %s325_s8 }
  0x31   : > { %v350_v3 = vpop.eup %349 }
  0x32   : > { %v173_v4 = vmul.f32 0.5, %v350_v3 }
  0x34   : > { %v434_v5 = vadd.f32 0.5, %v173_v4 }
  0x36   : > { %351 = vlog2.f32 %v434_v5 }
  0x37   : > { %353 = vtanh.f32 %v434_v5 }
  0x43   : > { %v352_v6 = vpop.eup %351 }
  0x44   : > { %v176_v10 = vmul.f32 0.6931472, %v352_v6  ;;  %v354_v40 = vpop.eup %353 }
  0x45   : > { %v215_v42 = vmul.f32 %v354_v40, %v214_v39  ;;  %v224_v44 = vmul.f32 %v354_v40, %v223_v41  ;;  %v210_v60 = vmul.f32 %v354_v40, %v209_v55 }
  0x46   : > { %v177_v17 = vmul.f32 %v176_v10, %v176_v10  ;;  %v180_v18 = vmul.f32 %v179_v7, %v176_v10  ;;  %v190_v19 = vmul.f32 %v189_v8, %v176_v10  ;;  %v200_v20 = vmul.f32 %v199_v9, %v176_v10 }
  0x48   : > { %v182_v21 = vadd.f32 %v181_v11, %v180_v18  ;;  %v184_v22 = vmul.f32 %v183_v12, %v177_v17  ;;  %v192_v23 = vadd.f32 %v191_v13, %v190_v19  ;;  %v194_v24 = vmul.f32 %v193_v14, %v177_v17 }
  0x49   : > { %v202_v25 = vadd.f32 %v201_v15, %v200_v20  ;;  %v204_v26 = vmul.f32 %v203_v16, %v177_v17  ;;  %v230_v52 = vadd.f32 %v177_v17, %v176_v10 }
  0x4a   : > { %v195_v27 = vadd.f32 %v194_v24, %v192_v23  ;;  %v185_v30 = vadd.f32 %v184_v22, %v182_v21 }
  0x4b   : > { %v205_v29 = vadd.f32 %v204_v26, %v202_v25 }
  0x4c   : > { %v196_v31 = vmul.f32 %v195_v27, %v434_v5  ;;  %v186_v36 = vmul.f32 %v185_v30, %v434_v5 }
  0x4d   : > { %v206_v33 = vmul.f32 %v205_v29, %v434_v5 }
  0x4e   : > { %v198_v34 = vadd.f32 %v197_v28, %v196_v31  ;;  %v188_v38 = vadd.f32 %v187_v37, %v186_v36 }
  0x4f   : > { %v208_v35 = vadd.f32 %v207_v32, %v206_v33 }
  0x50   : > { %355 = vtanh.f32 %v198_v34 }
  0x51   : > { %357 = vtanh.f32 %v208_v35 }
  0x52   : > { %359 = vtanh.f32 %v188_v38 }
  0x5d   : > { %v356_v43 = vpop.eup %355 }
  0x5e   : > { %v358_v45 = vpop.eup %357  ;;  %v217_v46 = vadd.f32 1.0, %v356_v43 }
  0x5f   : > { %v226_v47 = vadd.f32 1.0, %v358_v45  ;;  %v360_v54 = vpop.eup %359 }
  0x60   : > { %v218_v48 = vmul.f32 %v217_v46, %v215_v42  ;;  %v212_v61 = vadd.f32 1.0, %v360_v54 }
  0x61   : > { %v227_v49 = vmul.f32 %v226_v47, %v224_v44 }
  0x62   : > { %v220_v50 = vmul.f32 %v218_v48, %v218_v48  ;;  %v219_v56 = vadd.f32 1.0, %v218_v48  ;;  %v213_v1 = vmul.f32 %v212_v61, %v210_v60 }
  0x63   : > { %v228_v51 = vmul.f32 %v227_v49, %v176_v10  ;;  %v231_v53 = vmul.f32 %v227_v49, %v227_v49 }
  0x64   : > { %v221_v57 = vmul.f32 0.5, %v220_v50 }
  0x65   : > { %v229_v58 = vadd.f32 1.0, %v228_v51  ;;  %v232_v59 = vmul.f32 0.5, %v231_v53 }
  0x66   : > { %v222_v63 = vadd.f32 %v221_v57, %v219_v56 }
  0x67   : > { %v233_v62 = vmul.f32 %v232_v59, %v230_v52 }
  0x69   : > { %v234_v0 = vadd.f32 %v233_v62, %v229_v58 }
  0x6b   : > { %v235_v2 = vmul.f32 %v234_v0, %v434_v5 }
  0x6d   : > { %v236_v3 = vmul.f32 %v235_v2, %v222_v63 }
  0x6f   : > { %v237_v4 = vadd.f32 %v236_v3, %v213_v1 }
  0x71   : > { %238 = vst [vmem:[%s152_s13] sm:$0xff] %v237_v4 }
  0x72 PF: > { %s13_s9 = sadd.s32 1, %s386_s9  }
  0x73   : > { %p10_p1 = scmp.ge.s32.totalorder %s13_s9, 4  }
  0x75   :  { %12 = sbr.rel (!%p10_p1) target bundleno = 1 (0x1), region = 63 }
  0x7a   :  { %258 = vsyncpa [#allocation3], 1 }
  0x7b   :  { %260 = vsyncpa [#allocation3 + $0x1], 1 }

</bundles_post_ra>
